<compile_context>
chip_gen: v6e
topology: v6e:2x2x1
jax: 0.10.0
libtpu: 0.0.40
codegen_flags: <defaults>
</compile_context>

<pallas_src>
import functools
import math

import jax
import jax.numpy as jnp
from jax import lax
from jax.experimental import pallas as pl
from jax.experimental.pallas import tpu as pltpu

ADAPTATION_FACTOR = 0.1


# --------------------------------------------------------------------------- #
# Pallas kernel: streamed, sanitized, per-batch sequence sum.
# --------------------------------------------------------------------------- #
def _pooled_sum_kernel(x_ref, out_ref, *, seq_len, s_blk, blocks_per_split):
    c = pl.program_id(0)          # sequence-split index ("parallel" -> per-TC on v7x)
    s = pl.program_id(1)          # seq-block index within the split ("arbitrary")

    @pl.when(s == 0)
    def _init():
        out_ref[...] = jnp.zeros_like(out_ref)

    x = x_ref[...]                                       # [B, s_blk, H], native dtype
    # torch.nan_to_num(x, nan=0.0, posinf=1.0, neginf=-1.0), done in the native
    # dtype so bf16 inputs are sanitized on packed bf16 vregs; cast to f32 only
    # for the accumulate.
    x = jnp.where(x != x, 0.0, x)                        # NaN  -> 0
    x = jnp.where(x == jnp.inf, 1.0, x)                  # +inf -> 1
    x = jnp.where(x == -jnp.inf, -1.0, x)                # -inf -> -1

    blk = c * blocks_per_split + s                       # logical seq-block index
    is_tail = (blk + 1) * s_blk > seq_len                # partial or fully-OOB block

    @pl.when(jnp.logical_not(is_tail))
    def _steady():                                       # unmasked steady-state path
        out_ref[...] += jnp.sum(x.astype(jnp.float32), axis=1)[None]

    @pl.when(is_tail)
    def _tail():                                         # mask padded / OOB rows only here
        pos = blk * s_blk + lax.broadcasted_iota(jnp.int32, x.shape, 1)
        xm = jnp.where(pos < seq_len, x.astype(jnp.float32), 0.0)
        out_ref[...] += jnp.sum(xm, axis=1)[None]


def _pick_seq_block(batch, seq, hidden, itemsize, target_tile_bytes=8 << 20):
    """~8 MiB per x tile (double-buffered -> ~16 MiB), floor = dtype sublane min."""
    min_rows = max(8, 32 // max(1, int(itemsize)))       # 8 f32 / 16 bf16 / 32 int8
    row_bytes = batch * hidden * itemsize
    if seq * row_bytes <= target_tile_bytes:
        return int(seq)                                  # whole sequence in one tile
    rows = target_tile_bytes // row_bytes
    rows = max(min_rows, (rows // min_rows) * min_rows)
    # TODO(synk): if batch*hidden*itemsize is so large that even min_rows rows blow
    # the VMEM budget, a 2-D (batch, seq) tiling would be needed; not implemented.
    return int(min(seq, rows))


def _pooled_mean(x, *, s_blk, num_splits):
    """Sanitized mean over the sequence axis, computed by the Pallas kernel."""
    batch, seq, hidden = x.shape
    itemsize = jnp.dtype(x.dtype).itemsize
    total_blocks = pl.cdiv(seq, s_blk)
    bps = pl.cdiv(total_blocks, num_splits)

    # Keep every DMA in bounds: clamp the block index; out-of-range logical blocks
    # are fully masked to zero inside the kernel.
    def x_map(c, s):
        return (0, jnp.minimum(c * bps + s, total_blocks - 1), 0)

    tile_bytes = batch * s_blk * hidden * itemsize
    out_blk_bytes = batch * hidden * 4
    est = 2 * tile_bytes + 2 * out_blk_bytes + (2 << 20)     # dbl-buffered x + out + slack
    vmem_limit = int(min(max(est, 32 << 20), 64 << 20))      # headroom, v7x has 64 MiB

    kernel = functools.partial(_pooled_sum_kernel, seq_len=seq, s_blk=s_blk,
                               blocks_per_split=bps)
    partial_sums = pl.pallas_call(
        kernel,
        out_shape=jax.ShapeDtypeStruct((num_splits, batch, hidden), jnp.float32),
        grid=(num_splits, bps),
        in_specs=[pl.BlockSpec((batch, s_blk, hidden), x_map)],
        out_specs=pl.BlockSpec((1, batch, hidden), lambda c, s: (c, 0, 0)),
        compiler_params=pltpu.CompilerParams(
            dimension_semantics=("parallel", "arbitrary"),
            vmem_limit_bytes=vmem_limit),
    )(x)
    return partial_sums.sum(axis=0) * jnp.float32(1.0 / seq)     # [B, H]


# --------------------------------------------------------------------------- #
# Full forward (finalize MLP / softmax / top-k in plain JAX, per perf review).
# --------------------------------------------------------------------------- #
@functools.partial(jax.jit, static_argnames=("num_layers", "k", "s_blk", "num_splits"))
def _router_core(x, w1, b1, w2, b2, lc, *, num_layers, k, s_blk, num_splits):
    pooled = _pooled_mean(x, s_blk=s_blk, num_splits=num_splits)          # [B, H] f32

    # complexity_analyzer: Linear -> GELU(exact erf, as torch nn.GELU) -> Linear
    h = jnp.dot(pooled, w1, preferred_element_type=jnp.float32) + b1
    h = 0.5 * h * (1.0 + lax.erf(h * (1.0 / math.sqrt(2.0))))
    tf = jnp.dot(h, w2, preferred_element_type=jnp.float32) + b2          # [B, 2L]

    tf_mean = jnp.mean(tf, axis=0).reshape(num_layers, 2)
    adaptive = lc + ADAPTATION_FACTOR * tf_mean
    coeff = jax.nn.softmax(adaptive, axis=-1)                              # [L, 2]

    # NaN/Inf safeguard of the module (fallback coefficients / active mask).
    bad = jnp.logical_or(jnp.logical_not(jnp.all(jnp.isfinite(pooled))),
                         jnp.logical_not(jnp.all(jnp.isfinite(tf))))
    fb_coeff = jax.nn.softmax(
        jnp.stack([jnp.full((num_layers,), 0.6, jnp.float32),
                   jnp.full((num_layers,), 0.4, jnp.float32)], axis=-1), axis=-1)
    fb_active = (jnp.zeros((num_layers,), jnp.bool_)
                 .at[0::2].set(True).at[0].set(True).at[-1].set(True))
    coeff = jnp.where(bad, fb_coeff, coeff)

    importance = coeff.sum(axis=-1)
    _, idx = lax.top_k(importance, k)
    active = (jnp.zeros((num_layers,), jnp.bool_)
              .at[idx].set(True).at[0].set(True).at[-1].set(True))
    active = jnp.where(bad, fb_active, active)
    return coeff, active


def init_layer_router_params(key, hidden_size, num_layers):
    h2 = hidden_size // 2
    k1, k2, k3, k4 = jax.random.split(key, 4)
    w1 = jax.random.normal(k1, (hidden_size, h2), jnp.float32) / math.sqrt(hidden_size)
    b1 = jax.random.normal(k2, (1, h2), jnp.float32) * 0.01
    w2 = jax.random.normal(k3, (h2, num_layers * 2), jnp.float32) / math.sqrt(h2)
    b2 = jax.random.normal(k4, (1, num_layers * 2), jnp.float32) * 0.01
    layer_coefficients = jnp.stack(
        [jnp.full((num_layers,), 0.6, jnp.float32),
         jnp.full((num_layers,), 0.4, jnp.float32)], axis=-1)              # [L, 2]
    sparsity_controller = jnp.ones((1,), jnp.float32) * 0.5
    return dict(w1=w1, b1=b1, w2=w2, b2=b2,
                layer_coefficients=layer_coefficients,
                sparsity_controller=sparsity_controller)


def prepare_router_params(params, num_layers):
    """One-time prep: sparsity_controller -> static k (no per-call host sync)."""
    prepped = dict(w1=params["w1"], b1=params["b1"], w2=params["w2"], b2=params["b2"],
                   layer_coefficients=params["layer_coefficients"])
    sparsity = 1.0 / (1.0 + math.exp(-float(params["sparsity_controller"][0])))
    min_active = max(1, int(0.25 * num_layers))
    k = max(min_active, int((1.0 - sparsity) * num_layers))
    return prepped, k


def layer_router_forward(x, prepped, k, num_layers, seq_block=None):
    batch, seq, hidden = x.shape
    if hidden != prepped["w1"].shape[0]:
        raise ValueError(f"hidden dim {hidden} != expected {prepped['w1'].shape[0]}")
    itemsize = jnp.dtype(x.dtype).itemsize
    s_blk = int(seq_block) if seq_block is not None else _pick_seq_block(
        batch, seq, hidden, itemsize)
    total_blocks = pl.cdiv(seq, s_blk)
    num_splits = 2 if total_blocks >= 2 else 1          # feed both TCs on v7x
    return _router_core(x, prepped["w1"], prepped["b1"], prepped["w2"],
                        prepped["b2"], prepped["layer_coefficients"],
                        num_layers=num_layers, k=k, s_blk=s_blk,
                        num_splits=num_splits)


def _reference_forward(x, params, num_layers):
    # Plain-JAX reference of the module's math, for self-check.
    xf = x.astype(jnp.float32)
    xf = jnp.nan_to_num(xf, nan=0.0, posinf=1.0, neginf=-1.0)
    pooled = xf.mean(axis=1)
    h = pooled @ params["w1"] + params["b1"]
    h = 0.5 * h * (1.0 + lax.erf(h / jnp.sqrt(2.0)))
    tf = h @ params["w2"] + params["b2"]
    tf = tf.mean(axis=0).reshape(num_layers, 2)
    adaptive = params["layer_coefficients"] + ADAPTATION_FACTOR * tf
    return jax.nn.softmax(adaptive, axis=-1)


if __name__ == "__main__":
    batch, seq, hidden, num_layers = 2, 8, 32, 8

    key = jax.random.PRNGKey(0)
    kx, kp = jax.random.split(key)
    x = jax.random.normal(kx, (batch, seq, hidden), jnp.float32)
    # exercise the nan_to_num path
    x = x.at[0, 0, 0].set(jnp.nan).at[1, 2, 3].set(jnp.inf).at[1, 4, 5].set(-jnp.inf)

    params = init_layer_router_params(kp, hidden, num_layers)
    prepped, k = prepare_router_params(params, num_layers)

    coefficients, active_layers = layer_router_forward(x, prepped, k, num_layers)
    coefficients = jax.block_until_ready(coefficients)
    active_layers = jax.block_until_ready(active_layers)

    ref = _reference_forward(x, params, num_layers)
    assert coefficients.shape == (num_layers, 2)
    assert active_layers.shape == (num_layers,) and active_layers.dtype == jnp.bool_
    assert jnp.allclose(coefficients, ref, atol=1e-4), (coefficients, ref)
    assert bool(active_layers[0]) and bool(active_layers[-1])

    # bf16 input path: sanitize runs on packed bf16 vregs, accumulate in f32.
    x_bf16 = x.astype(jnp.bfloat16)
    coeff_bf16, _ = layer_router_forward(x_bf16, prepped, k, num_layers)
    coeff_bf16 = jax.block_until_ready(coeff_bf16)
    ref_bf16 = _reference_forward(x_bf16.astype(jnp.float32), params, num_layers)
    assert jnp.allclose(coeff_bf16, ref_bf16, atol=1e-4), (coeff_bf16, ref_bf16)

    # Multi-block path: 2-way split ("parallel" axis), steady-state tiles,
    # a partial tail tile, and one fully out-of-range (masked) tile.
    b2_, s2_, h2_, l2_ = 2, 150, 256, 12
    x2 = jax.random.normal(jax.random.PRNGKey(1), (b2_, s2_, h2_), jnp.bfloat16)
    params2 = init_layer_router_params(jax.random.PRNGKey(2), h2_, l2_)
    prepped2, k2 = prepare_router_params(params2, l2_)
    c2, a2 = layer_router_forward(x2, prepped2, k2, l2_, seq_block=64)
    c2 = jax.block_until_ready(c2)
    ref2 = _reference_forward(x2.astype(jnp.float32), params2, l2_)
    assert jnp.allclose(c2, ref2, atol=1e-4), (c2, ref2)
    assert bool(a2[0]) and bool(a2[-1])

    print("KERNEL_OK")
</pallas_src>

<mosaic_0001>
module attributes {stable_mosaic.version = 11 : i64} {
  func.func @_pooled_sum_kernel(%arg0: i32, %arg1: i32, %arg2: memref<2x8x32xf32, #tpu.memory_space<vmem>>, %arg3: memref<1x2x32xf32, #tpu.memory_space<vmem>>) attributes {dimension_semantics = [#tpu.dimension_semantics<parallel>, #tpu.dimension_semantics<arbitrary>], iteration_bounds = array<i64: 1, 1>, scalar_prefetch = 0 : i64, scratch_operands = 0 : i64, tpu.core_type = #tpu.core_type<tc>, window_params = [{transform_indices = @transform_0, window_bounds = array<i64: 2, 8, 32>}, {transform_indices = @transform_1, window_bounds = array<i64: 1, 2, 32>}]} {
    %c0_i32 = arith.constant 0 : i32
    %0 = arith.cmpi eq, %arg1, %c0_i32 : i32
    %1 = arith.extui %0 : i1 to i32
    %c0_i32_0 = arith.constant 0 : i32
    %2 = arith.cmpi ne, %1, %c0_i32_0 : i32
    scf.if %2 {
      %cst_11 = arith.constant 0.000000e+00 : f32
      %25 = vector.broadcast %cst_11 : f32 to vector<1x2x32xf32>
      %c0_12 = arith.constant 0 : index
      %c0_13 = arith.constant 0 : index
      %c0_14 = arith.constant 0 : index
      %26 = vector.load %arg3[%c0_12, %c0_13, %c0_14] : memref<1x2x32xf32, #tpu.memory_space<vmem>>, vector<1x2x32xf32>
      tpu.vector_store %arg3[%c0_12, %c0_13, %c0_14], %25 {strides = array<i32>} : memref<1x2x32xf32, #tpu.memory_space<vmem>>, vector<1x2x32xf32>,
    } else {
    }
    %c0 = arith.constant 0 : index
    %c0_1 = arith.constant 0 : index
    %c0_2 = arith.constant 0 : index
    %3 = vector.load %arg2[%c0, %c0_1, %c0_2] : memref<2x8x32xf32, #tpu.memory_space<vmem>>, vector<2x8x32xf32>
    %4 = arith.cmpf one, %3, %3 : vector<2x8x32xf32>
    %cst = arith.constant 0.000000e+00 : f32
    %5 = vector.broadcast %cst : f32 to vector<2x8x32xf32>
    %6 = arith.select %4, %5, %3 : vector<2x8x32xi1>, vector<2x8x32xf32>
    %cst_3 = arith.constant 0x7F800000 : f32
    %7 = vector.broadcast %cst_3 : f32 to vector<2x8x32xf32>
    %8 = arith.cmpf oeq, %6, %7 : vector<2x8x32xf32>
    %cst_4 = arith.constant 1.000000e+00 : f32
    %9 = vector.broadcast %cst_4 : f32 to vector<2x8x32xf32>
    %10 = arith.select %8, %9, %6 : vector<2x8x32xi1>, vector<2x8x32xf32>
    %cst_5 = arith.constant 0xFF800000 : f32
    %11 = vector.broadcast %cst_5 : f32 to vector<2x8x32xf32>
    %12 = arith.cmpf oeq, %10, %11 : vector<2x8x32xf32>
    %cst_6 = arith.constant -1.000000e+00 : f32
    %13 = vector.broadcast %cst_6 : f32 to vector<2x8x32xf32>
    %14 = arith.select %12, %13, %10 : vector<2x8x32xi1>, vector<2x8x32xf32>
    %c1_i32 = arith.constant 1 : i32
    %15 = arith.muli %arg0, %c1_i32 : i32
    %16 = arith.addi %15, %arg1 : i32
    %c1_i32_7 = arith.constant 1 : i32
    %17 = arith.addi %16, %c1_i32_7 : i32
    %c8_i32 = arith.constant 8 : i32
    %18 = arith.muli %17, %c8_i32 : i32
    %c8_i32_8 = arith.constant 8 : i32
    %19 = arith.cmpi sgt, %18, %c8_i32_8 : i32
    %true = arith.constant true
    %20 = arith.xori %19, %true : i1
    %21 = arith.extui %20 : i1 to i32
    %c0_i32_9 = arith.constant 0 : i32
    %22 = arith.cmpi ne, %21, %c0_i32_9 : i32
    scf.if %22 {
      %c0_11 = arith.constant 0 : index
      %c0_12 = arith.constant 0 : index
      %c0_13 = arith.constant 0 : index
      %25 = vector.load %arg3[%c0_11, %c0_12, %c0_13] : memref<1x2x32xf32, #tpu.memory_space<vmem>>, vector<1x2x32xf32>
      %cst_14 = arith.constant dense<0.000000e+00> : vector<2x32xf32>
      %26 = vector.multi_reduction <add>, %14, %cst_14 [1] : vector<2x8x32xf32> to vector<2x32xf32>
      %27 = vector.shape_cast %26 : vector<2x32xf32> to vector<1x2x32xf32>
      %28 = arith.addf %25, %27 : vector<1x2x32xf32>
      %c0_15 = arith.constant 0 : index
      %c0_16 = arith.constant 0 : index
      %c0_17 = arith.constant 0 : index
      %29 = vector.load %arg3[%c0_15, %c0_16, %c0_17] : memref<1x2x32xf32, #tpu.memory_space<vmem>>, vector<1x2x32xf32>
      tpu.vector_store %arg3[%c0_15, %c0_16, %c0_17], %28 {strides = array<i32>} : memref<1x2x32xf32, #tpu.memory_space<vmem>>, vector<1x2x32xf32>,
    } else {
    }
    %23 = arith.extui %19 : i1 to i32
    %c0_i32_10 = arith.constant 0 : i32
    %24 = arith.cmpi ne, %23, %c0_i32_10 : i32
    scf.if %24 {
      %c8_i32_11 = arith.constant 8 : i32
      %25 = arith.muli %16, %c8_i32_11 : i32
      %26 = tpu.iota {dimensions = array<i32: 1>} : vector<2x8x32xi32>
      %27 = vector.broadcast %25 : i32 to vector<2x8x32xi32>
      %28 = arith.addi %27, %26 : vector<2x8x32xi32>
      %c8_i32_12 = arith.constant 8 : i32
      %29 = vector.broadcast %c8_i32_12 : i32 to vector<2x8x32xi32>
      %30 = arith.cmpi slt, %28, %29 : vector<2x8x32xi32>
      %cst_13 = arith.constant 0.000000e+00 : f32
      %31 = vector.broadcast %cst_13 : f32 to vector<2x8x32xf32>
      %32 = arith.select %30, %14, %31 : vector<2x8x32xi1>, vector<2x8x32xf32>
      %c0_14 = arith.constant 0 : index
      %c0_15 = arith.constant 0 : index
      %c0_16 = arith.constant 0 : index
      %33 = vector.load %arg3[%c0_14, %c0_15, %c0_16] : memref<1x2x32xf32, #tpu.memory_space<vmem>>, vector<1x2x32xf32>
      %cst_17 = arith.constant dense<0.000000e+00> : vector<2x32xf32>
      %34 = vector.multi_reduction <add>, %32, %cst_17 [1] : vector<2x8x32xf32> to vector<2x32xf32>
      %35 = vector.shape_cast %34 : vector<2x32xf32> to vector<1x2x32xf32>
      %36 = arith.addf %33, %35 : vector<1x2x32xf32>
      %c0_18 = arith.constant 0 : index
      %c0_19 = arith.constant 0 : index
      %c0_20 = arith.constant 0 : index
      %37 = vector.load %arg3[%c0_18, %c0_19, %c0_20] : memref<1x2x32xf32, #tpu.memory_space<vmem>>, vector<1x2x32xf32>
      tpu.vector_store %arg3[%c0_18, %c0_19, %c0_20], %36 {strides = array<i32>} : memref<1x2x32xf32, #tpu.memory_space<vmem>>, vector<1x2x32xf32>,
    } else {
    }
    return
  }
  func.func @transform_0(%arg0: i32, %arg1: i32) -> (i32, i32, i32) {
    %c1_i32 = arith.constant 1 : i32
    %0 = arith.muli %arg0, %c1_i32 : i32
    %1 = arith.addi %0, %arg1 : i32
    %c0_i32 = arith.constant 0 : i32
    %2 = arith.minsi %1, %c0_i32 : i32
    %c0_i32_0 = arith.constant 0 : i32
    %c0_i32_1 = arith.constant 0 : i32
    %c0_i32_2 = arith.constant 0 : i32
    return %c0_i32_0, %2, %c0_i32_1 : i32, i32, i32
  }
  func.func @transform_1(%arg0: i32, %arg1: i32) -> (i32, i32, i32) {
    %c0_i32 = arith.constant 0 : i32
    %c0_i32_0 = arith.constant 0 : i32
    %c0_i32_1 = arith.constant 0 : i32
    return %arg0, %c0_i32, %c0_i32_0 : i32, i32, i32
  }
}

</mosaic_0001>

<bundles_post_ra>
// kernel: _router_core.1
= control target key start
LH: loop header
LB: loop body
LE: loop exit
PB: predicated region body
PF: predicated region fallthrough
CT: control target
= control target key end

     0   :  { %6 = vsyncpa [#allocation3], 0  ;;  %s150_s6 = smov [#allocation2]   ;;  %s178_s0 = inlined_call_operand.hbm [shape: f32[2,8,32], index: 0, kind: input, shape index: {}]   ;;  %s179_s1 = inlined_call_operand.vmem [shape: f32[1,2,32], index: 1, kind: output, shape index: {}]  }
   0x1   :  { %s17_s7 = sshll.u32 %s150_s6, 4  ;;  %s18_s7 = int_to_ptr.vmem [resolvable:$true] %s17_s7 }
   0x2   :  { %s136_s8 = scalar_lea.vmem %s18_s7, 256  ;;  %p141_p1 = scmp.lt.s32.totalorder %s18_s7, %s18_s7 }
   0x3   :  { %p137_p0 = scmp.ne.s32.totalorder %s18_s7, %s136_s8  ;;  %p142_p2 = scmp.lt.s32.totalorder %s136_s8, %s136_s8 }
   0x5   :  { %p143_p3 = por %p142_p2, %p141_p1 }
   0x7   :  { %p144_p4 = pnand %p143_p3, %p137_p0 }
   0x9   :  { %147 = shalt.err (!%p144_p4)
}
   0xa   :  { %s151_s9 = smov 128   ;;  %s152_s10 = smov 8  }
   0xb   :  { %23 = dma.hbm_to_vmem [thread:$0]  %s178_s0, 256, %s18_s7, [#allocation3], %s151_s9, %s151_s9, %s152_s10  }
   0xc   :  { %148 = dma.done.wait [#allocation3], 256  }
   0xd   :  { %149 = vsyncadd [#allocation3], 4294967040  ;;  %vm34_vm0 = vcmask 254976   ;;  %v153_v0 = vmov 0.0   ;;  %v36_v1 = vld [vmem:[#allocation2] sm:$0xff]  ;;  %v37_v2 = vld [vmem:[#allocation2 + $0x8] sm:$0xff] }
   0xe   :  { %35 = vst.msk [vmem:[%s179_s1] sm:$0x3] %vm34_vm0, %v153_v0  ;;  %vm38_vm1 = vcmp.ne.f32.partialorder %v36_v1, %v36_v1  ;;  %vm39_vm2 = vcmp.ne.f32.partialorder %v37_v2, %v37_v2  ;;  %vm59_vm5 = vcmask 261120   ;;  %vm76_vm8 = vcmask 1041409  }
   0xf   :  { %v40_v3 = vsel %vm38_vm1, 0.0, %v36_v1  ;;  %v41_v4 = vsel %vm39_vm2, 0.0, %v37_v2 }
  0x10   :  { %vm42_vm3 = vcmp.eq.f32.partialorder %v40_v3, inf  ;;  %vm43_vm4 = vcmp.eq.f32.partialorder %v41_v4, inf }
  0x11   :  { %v44_v5 = vsel %vm42_vm3, 1.0, %v40_v3  ;;  %v45_v6 = vsel %vm43_vm4, 1.0, %v41_v4 }
  0x12   :  { %vm46_vm6 = vcmp.eq.f32.partialorder %v44_v5, -inf  ;;  %vm47_vm7 = vcmp.eq.f32.partialorder %v45_v6, -inf }
  0x13   :  { %v48_v7 = vsel %vm46_vm6, -1.0, %v44_v5  ;;  %v49_v8 = vsel %vm47_vm7, -1.0, %v45_v6 }
  0x14   :  { %v60_v9 = vsel %vm59_vm5, %v48_v7, 0.0  ;;  %v67_v10 = vsel %vm59_vm5, %v49_v8, 0.0 }
  0x15   :  { %v61_v11 = vrot.slane %v60_v9, 4  ;;  %v68_v12 = vrot.slane %v67_v10, 4  ;;  %v58_v21 = vld [vmem:[%s179_s1] sm:$0x3] }
  0x17   :  { %v62_v13 = vadd.f32 %v61_v11, %v60_v9  ;;  %v69_v14 = vadd.f32 %v68_v12, %v67_v10 }
  0x19   :  { %v63_v15 = vrot.slane %v62_v13, 2  ;;  %v70_v16 = vrot.slane %v69_v14, 2 }
  0x1b   :  { %v64_v17 = vadd.f32 %v63_v15, %v62_v13  ;;  %v71_v18 = vadd.f32 %v70_v16, %v69_v14 }
  0x1d   :  { %v65_v19 = vrot.slane %v64_v17, 1  ;;  %v72_v20 = vrot.slane %v71_v18, 1 }
  0x1f   :  { %v66_v22 = vadd.f32 %v65_v19, %v64_v17  ;;  %v73_v23 = vadd.f32 %v72_v20, %v71_v18 }
  0x21   :  { %v77_v24 = vsel %vm76_vm8, %v73_v23, %v66_v22 }
  0x22   :  { %v79_v25 = vadd.f32 %v77_v24, %v58_v21 }
  0x24   :  { %81 = vst.msk [vmem:[%s179_s1] sm:$0x3] %vm34_vm0, %v79_v25 }
  0x25   :  { %121 = vsyncpa [#allocation3], 1 }

</bundles_post_ra>
